<compile_context>
chip_gen: v6e
topology: v6e:2x2x1
jax: 0.10.0
libtpu: 0.0.40
codegen_flags: <defaults>
</compile_context>

<pallas_src>
import functools

import jax
import jax.numpy as jnp
from jax import lax
from jax.experimental import pallas as pl
from jax.experimental.pallas import tpu as pltpu


# ---------------------------------------------------------------------------
# Pallas kernel
# ---------------------------------------------------------------------------
def _rnn_model_kernel(
    x_ref,        # (T*B_pad, F)  time-major, batch padded to a full sublane tile
    wih_t_ref,    # (F, H)        W_ih^T  (pre-transposed in wrapper)
    whh_t_ref,    # (H, H)        W_hh^T  (pre-transposed in wrapper)
    b_rnn_ref,    # (1, H)        b_ih + b_hh
    wfc_t_ref,    # (H, D)        fc weight^T
    b_fc_ref,     # (1, D)
    whead_t_ref,  # (D, 2O)       [w_mean; w_vars]^T (fused head)
    b_head_ref,   # (1, 2O)
    out_ref,      # (T*B_pad, 2O) [:, :O] = mu, [:, O:] = softplus(vars pre-act)
    *,
    seq_len,      # T      (static)
    batch_pad,    # B_pad  (static, multiple of 8)
    out_size,     # O      (static)
):
    # Loaded once; the only per-step matmul RHS -> Mosaic keeps it staged in the MXU
    # weight registers across the fully-unrolled recurrence.
    whh_t = whh_t_ref[...]

    # --- Hoisted input projection: one MXU matmul for ALL timesteps, biases folded in.
    xw = (
        jnp.dot(x_ref[...], wih_t_ref[...], preferred_element_type=jnp.float32)
        + b_rnn_ref[...]
    )  # (T*B_pad, H)

    # --- Elman recurrence, fully unrolled (T static):
    #     h_t = tanh(xw_t + h_{t-1} @ W_hh^T)        (PyTorch default h0 = zeros)
    # Hidden states stay in vregs (no VMEM scratch round-trip).
    h = jnp.zeros((batch_pad, whh_t.shape[0]), dtype=jnp.float32)
    hs = []
    for t in range(seq_len):
        lo = t * batch_pad  # static, sublane-aligned slice start
        pre = xw[lo:lo + batch_pad, :] + jnp.dot(
            h, whh_t, preferred_element_type=jnp.float32
        )
        h = jnp.tanh(pre)
        hs.append(h)

    r = jnp.concatenate(hs, axis=0)                                 # (T*B_pad, H), in vregs

    # --- Dense head over all timesteps at once (lane/sublane-dense 2D matmuls).
    y = jnp.maximum(
        jnp.dot(r, wfc_t_ref[...], preferred_element_type=jnp.float32)
        + b_fc_ref[...],
        0.0,
    )                                                               # relu, (T*B_pad, D)

    head = (
        jnp.dot(y, whead_t_ref[...], preferred_element_type=jnp.float32)
        + b_head_ref[...]
    )                                                               # (T*B_pad, 2O)

    # Numerically stable softplus applied only to the vars half via a lane mask.
    sp = jnp.log1p(jnp.exp(-jnp.abs(head))) + jnp.maximum(head, 0.0)
    col = lax.broadcasted_iota(jnp.int32, head.shape, 1)
    out_ref[...] = jnp.where(col < out_size, head, sp)              # single wide store


# ---------------------------------------------------------------------------
# Wrapper
# ---------------------------------------------------------------------------
@jax.jit
def rnn_model_forward(x, params):
    """x: (batch, seq, input_size) float32.  Returns (mu, vars), each (batch, seq, output_size)."""
    B, T, F_in = x.shape
    H = params["w_hh"].shape[0]
    D = params["w_fc"].shape[0]
    O = params["w_mean"].shape[0]

    # Pad the batch (sublane) dimension to a full 8-row tile: the recurrence then
    # works on whole sublane tiles (no masked sub-tile extracts on the serial path).
    SUBLANE = 8
    B_pad = max(SUBLANE, ((B + SUBLANE - 1) // SUBLANE) * SUBLANE)
    x_p = jnp.pad(x, ((0, B_pad - B), (0, 0), (0, 0)))

    # Time-major then flatten to (T*B_pad, F).
    # TODO(synk): at production sizes fold this transpose (and the output transpose
    # below) into BlockSpec index_maps over a time grid axis instead of HBM copies.
    x_flat = jnp.transpose(x_p, (1, 0, 2)).reshape(T * B_pad, F_in)

    # Free layout plumbing in the wrapper: pre-transpose weights, fold RNN biases,
    # fuse mean/vars heads into one (D, 2O) weight.
    wih_t = params["w_ih"].T                                        # (F, H)
    whh_t = params["w_hh"].T                                        # (H, H)
    b_rnn = (params["b_ih"] + params["b_hh"]).reshape(1, H)
    wfc_t = params["w_fc"].T                                        # (H, D)
    b_fc = params["b_fc"].reshape(1, D)
    whead_t = jnp.concatenate([params["w_mean"], params["w_vars"]], axis=0).T  # (D, 2O)
    b_head = jnp.concatenate([params["b_mean"], params["b_vars"]]).reshape(1, 2 * O)

    vmem = pl.BlockSpec(memory_space=pltpu.MemorySpace.VMEM)
    kernel = functools.partial(
        _rnn_model_kernel, seq_len=T, batch_pad=B_pad, out_size=O
    )

    out = pl.pallas_call(
        kernel,
        out_shape=jax.ShapeDtypeStruct((T * B_pad, 2 * O), jnp.float32),
        in_specs=[vmem] * 8,
        out_specs=vmem,
        compiler_params=pltpu.CompilerParams(vmem_limit_bytes=32 * 1024 * 1024),
    )(x_flat, wih_t, whh_t, b_rnn, wfc_t, b_fc, whead_t, b_head)

    # (T*B_pad, 2O) -> (B, T, 2O): drop the padded batch rows, then split mu / vars.
    out = jnp.transpose(out.reshape(T, B_pad, 2 * O), (1, 0, 2))[:B]
    return out[..., :O], out[..., O:]


# ---------------------------------------------------------------------------
# Deterministic parameter init (PyTorch-style U(-1/sqrt(fan), 1/sqrt(fan)))
# ---------------------------------------------------------------------------
def init_params(key, input_size, hidden, dense, output):
    def uni(k, shape, fan):
        bound = 1.0 / jnp.sqrt(jnp.float32(fan))
        return jax.random.uniform(k, shape, jnp.float32, -bound, bound)

    ks = jax.random.split(key, 10)
    return {
        "w_ih": uni(ks[0], (hidden, input_size), hidden),
        "w_hh": uni(ks[1], (hidden, hidden), hidden),
        "b_ih": uni(ks[2], (hidden,), hidden),
        "b_hh": uni(ks[3], (hidden,), hidden),
        "w_fc": uni(ks[4], (dense, hidden), hidden),
        "b_fc": uni(ks[5], (dense,), hidden),
        "w_mean": uni(ks[6], (output, dense), dense),
        "b_mean": uni(ks[7], (output,), dense),
        "w_vars": uni(ks[8], (output, dense), dense),
        "b_vars": uni(ks[9], (output,), dense),
    }


# Pure-JAX reference for sanity checking the kernel.
def reference_forward(x, p):
    B, T, F_in = x.shape
    H = p["w_hh"].shape[0]

    def step(h, x_t):
        h_new = jnp.tanh(x_t @ p["w_ih"].T + p["b_ih"] + h @ p["w_hh"].T + p["b_hh"])
        return h_new, h_new

    _, r = lax.scan(step, jnp.zeros((B, H), jnp.float32), jnp.transpose(x, (1, 0, 2)))
    r = jnp.transpose(r, (1, 0, 2))                                  # (B, T, H)
    y = jax.nn.relu(r @ p["w_fc"].T + p["b_fc"])
    mu = y @ p["w_mean"].T + p["b_mean"]
    var = jax.nn.softplus(y @ p["w_vars"].T + p["b_vars"])
    return mu, var


if __name__ == "__main__":
    # Small shapes consistent with the module's forward:
    #   x: (batch=2, seq=8, input_size=4), hidden=32, n_hidden_dense=32, output_size=4
    batch, seq, input_size = 2, 8, 4
    hidden, dense, output = 32, 32, 4

    key = jax.random.PRNGKey(0)
    kx, kp = jax.random.split(key)
    x = jax.random.normal(kx, (batch, seq, input_size), dtype=jnp.float32)
    params = init_params(kp, input_size, hidden, dense, output)

    mu, var = rnn_model_forward(x, params)
    mu, var = jax.block_until_ready(mu), jax.block_until_ready(var)

    mu_ref, var_ref = reference_forward(x, params)
    assert mu.shape == (batch, seq, output) and var.shape == (batch, seq, output)
    assert jnp.allclose(mu, mu_ref, rtol=2e-3, atol=2e-3)
    assert jnp.allclose(var, var_ref, rtol=2e-3, atol=2e-3)
    assert bool(jnp.all(var > 0.0))

    print("KERNEL_OK")
</pallas_src>

<mosaic_0001>
module attributes {stable_mosaic.version = 11 : i64} {
  func.func @_rnn_model_kernel(%arg0: memref<64x4xf32, #tpu.memory_space<vmem>>, %arg1: memref<4x32xf32, #tpu.memory_space<vmem>>, %arg2: memref<32x32xf32, #tpu.memory_space<vmem>>, %arg3: memref<1x32xf32, #tpu.memory_space<vmem>>, %arg4: memref<32x32xf32, #tpu.memory_space<vmem>>, %arg5: memref<1x32xf32, #tpu.memory_space<vmem>>, %arg6: memref<32x8xf32, #tpu.memory_space<vmem>>, %arg7: memref<1x8xf32, #tpu.memory_space<vmem>>, %arg8: memref<64x8xf32, #tpu.memory_space<vmem>>) attributes {dimension_semantics = [], scalar_prefetch = 0 : i64, scratch_operands = 0 : i64, tpu.core_type = #tpu.core_type<tc>} {
    %c0 = arith.constant 0 : index
    %c0_0 = arith.constant 0 : index
    %0 = vector.load %arg2[%c0, %c0_0] : memref<32x32xf32, #tpu.memory_space<vmem>>, vector<32x32xf32>
    %c0_1 = arith.constant 0 : index
    %c0_2 = arith.constant 0 : index
    %1 = vector.load %arg0[%c0_1, %c0_2] : memref<64x4xf32, #tpu.memory_space<vmem>>, vector<64x4xf32>
    %c0_3 = arith.constant 0 : index
    %c0_4 = arith.constant 0 : index
    %2 = vector.load %arg1[%c0_3, %c0_4] : memref<4x32xf32, #tpu.memory_space<vmem>>, vector<4x32xf32>
    %cst = arith.constant dense<0.000000e+00> : vector<64x32xf32>
    %3 = tpu.matmul %1, %2, %cst {dimension_numbers = #tpu.dot_dimension_numbers<[1], [0], [0], [1], [0, 0, 1, 1], [], []>} : vector<64x4xf32>, vector<4x32xf32>, vector<64x32xf32> -> vector<64x32xf32>
    %c0_5 = arith.constant 0 : index
    %c0_6 = arith.constant 0 : index
    %4 = vector.load %arg3[%c0_5, %c0_6] : memref<1x32xf32, #tpu.memory_space<vmem>>, vector<1x32xf32>
    %5 = vector.broadcast %4 : vector<1x32xf32> to vector<64x32xf32>
    %6 = arith.addf %3, %5 : vector<64x32xf32>
    %cst_7 = arith.constant 0.000000e+00 : f32
    %7 = vector.broadcast %cst_7 : f32 to vector<8x32xf32>
    %8 = vector.extract_strided_slice %6 {offsets = [0, 0], sizes = [8, 32], strides = [1, 1]} : vector<64x32xf32> to vector<8x32xf32>
    %cst_8 = arith.constant dense<0.000000e+00> : vector<8x32xf32>
    %9 = tpu.matmul %7, %0, %cst_8 {dimension_numbers = #tpu.dot_dimension_numbers<[1], [0], [0], [1], [0, 0, 1, 1], [], []>} : vector<8x32xf32>, vector<32x32xf32>, vector<8x32xf32> -> vector<8x32xf32>
    %10 = arith.addf %8, %9 : vector<8x32xf32>
    %11 = math.tanh %10 : vector<8x32xf32>
    %12 = vector.extract_strided_slice %6 {offsets = [8, 0], sizes = [8, 32], strides = [1, 1]} : vector<64x32xf32> to vector<8x32xf32>
    %cst_9 = arith.constant dense<0.000000e+00> : vector<8x32xf32>
    %13 = tpu.matmul %11, %0, %cst_9 {dimension_numbers = #tpu.dot_dimension_numbers<[1], [0], [0], [1], [0, 0, 1, 1], [], []>} : vector<8x32xf32>, vector<32x32xf32>, vector<8x32xf32> -> vector<8x32xf32>
    %14 = arith.addf %12, %13 : vector<8x32xf32>
    %15 = math.tanh %14 : vector<8x32xf32>
    %16 = vector.extract_strided_slice %6 {offsets = [16, 0], sizes = [8, 32], strides = [1, 1]} : vector<64x32xf32> to vector<8x32xf32>
    %cst_10 = arith.constant dense<0.000000e+00> : vector<8x32xf32>
    %17 = tpu.matmul %15, %0, %cst_10 {dimension_numbers = #tpu.dot_dimension_numbers<[1], [0], [0], [1], [0, 0, 1, 1], [], []>} : vector<8x32xf32>, vector<32x32xf32>, vector<8x32xf32> -> vector<8x32xf32>
    %18 = arith.addf %16, %17 : vector<8x32xf32>
    %19 = math.tanh %18 : vector<8x32xf32>
    %20 = vector.extract_strided_slice %6 {offsets = [24, 0], sizes = [8, 32], strides = [1, 1]} : vector<64x32xf32> to vector<8x32xf32>
    %cst_11 = arith.constant dense<0.000000e+00> : vector<8x32xf32>
    %21 = tpu.matmul %19, %0, %cst_11 {dimension_numbers = #tpu.dot_dimension_numbers<[1], [0], [0], [1], [0, 0, 1, 1], [], []>} : vector<8x32xf32>, vector<32x32xf32>, vector<8x32xf32> -> vector<8x32xf32>
    %22 = arith.addf %20, %21 : vector<8x32xf32>
    %23 = math.tanh %22 : vector<8x32xf32>
    %24 = vector.extract_strided_slice %6 {offsets = [32, 0], sizes = [8, 32], strides = [1, 1]} : vector<64x32xf32> to vector<8x32xf32>
    %cst_12 = arith.constant dense<0.000000e+00> : vector<8x32xf32>
    %25 = tpu.matmul %23, %0, %cst_12 {dimension_numbers = #tpu.dot_dimension_numbers<[1], [0], [0], [1], [0, 0, 1, 1], [], []>} : vector<8x32xf32>, vector<32x32xf32>, vector<8x32xf32> -> vector<8x32xf32>
    %26 = arith.addf %24, %25 : vector<8x32xf32>
    %27 = math.tanh %26 : vector<8x32xf32>
    %28 = vector.extract_strided_slice %6 {offsets = [40, 0], sizes = [8, 32], strides = [1, 1]} : vector<64x32xf32> to vector<8x32xf32>
    %cst_13 = arith.constant dense<0.000000e+00> : vector<8x32xf32>
    %29 = tpu.matmul %27, %0, %cst_13 {dimension_numbers = #tpu.dot_dimension_numbers<[1], [0], [0], [1], [0, 0, 1, 1], [], []>} : vector<8x32xf32>, vector<32x32xf32>, vector<8x32xf32> -> vector<8x32xf32>
    %30 = arith.addf %28, %29 : vector<8x32xf32>
    %31 = math.tanh %30 : vector<8x32xf32>
    %32 = vector.extract_strided_slice %6 {offsets = [48, 0], sizes = [8, 32], strides = [1, 1]} : vector<64x32xf32> to vector<8x32xf32>
    %cst_14 = arith.constant dense<0.000000e+00> : vector<8x32xf32>
    %33 = tpu.matmul %31, %0, %cst_14 {dimension_numbers = #tpu.dot_dimension_numbers<[1], [0], [0], [1], [0, 0, 1, 1], [], []>} : vector<8x32xf32>, vector<32x32xf32>, vector<8x32xf32> -> vector<8x32xf32>
    %34 = arith.addf %32, %33 : vector<8x32xf32>
    %35 = math.tanh %34 : vector<8x32xf32>
    %36 = vector.extract_strided_slice %6 {offsets = [56, 0], sizes = [8, 32], strides = [1, 1]} : vector<64x32xf32> to vector<8x32xf32>
    %cst_15 = arith.constant dense<0.000000e+00> : vector<8x32xf32>
    %37 = tpu.matmul %35, %0, %cst_15 {dimension_numbers = #tpu.dot_dimension_numbers<[1], [0], [0], [1], [0, 0, 1, 1], [], []>} : vector<8x32xf32>, vector<32x32xf32>, vector<8x32xf32> -> vector<8x32xf32>
    %38 = arith.addf %36, %37 : vector<8x32xf32>
    %39 = math.tanh %38 : vector<8x32xf32>
    %40 = tpu.concatenate %11, %15, %19, %23, %27, %31, %35, %39 in 0 : vector<8x32xf32>, vector<8x32xf32>, vector<8x32xf32>, vector<8x32xf32>, vector<8x32xf32>, vector<8x32xf32>, vector<8x32xf32>, vector<8x32xf32> -> vector<64x32xf32>
    %c0_16 = arith.constant 0 : index
    %c0_17 = arith.constant 0 : index
    %41 = vector.load %arg4[%c0_16, %c0_17] : memref<32x32xf32, #tpu.memory_space<vmem>>, vector<32x32xf32>
    %cst_18 = arith.constant dense<0.000000e+00> : vector<64x32xf32>
    %42 = tpu.matmul %40, %41, %cst_18 {dimension_numbers = #tpu.dot_dimension_numbers<[1], [0], [0], [1], [0, 0, 1, 1], [], []>} : vector<64x32xf32>, vector<32x32xf32>, vector<64x32xf32> -> vector<64x32xf32>
    %c0_19 = arith.constant 0 : index
    %c0_20 = arith.constant 0 : index
    %43 = vector.load %arg5[%c0_19, %c0_20] : memref<1x32xf32, #tpu.memory_space<vmem>>, vector<1x32xf32>
    %44 = vector.broadcast %43 : vector<1x32xf32> to vector<64x32xf32>
    %45 = arith.addf %42, %44 : vector<64x32xf32>
    %cst_21 = arith.constant 0.000000e+00 : f32
    %46 = vector.broadcast %cst_21 : f32 to vector<64x32xf32>
    %47 = arith.maximumf %45, %46 : vector<64x32xf32>
    %c0_22 = arith.constant 0 : index
    %c0_23 = arith.constant 0 : index
    %48 = vector.load %arg6[%c0_22, %c0_23] : memref<32x8xf32, #tpu.memory_space<vmem>>, vector<32x8xf32>
    %cst_24 = arith.constant dense<0.000000e+00> : vector<64x8xf32>
    %49 = tpu.matmul %47, %48, %cst_24 {dimension_numbers = #tpu.dot_dimension_numbers<[1], [0], [0], [1], [0, 0, 1, 1], [], []>} : vector<64x32xf32>, vector<32x8xf32>, vector<64x8xf32> -> vector<64x8xf32>
    %c0_25 = arith.constant 0 : index
    %c0_26 = arith.constant 0 : index
    %50 = vector.load %arg7[%c0_25, %c0_26] : memref<1x8xf32, #tpu.memory_space<vmem>>, vector<1x8xf32>
    %51 = vector.broadcast %50 : vector<1x8xf32> to vector<64x8xf32>
    %52 = arith.addf %49, %51 : vector<64x8xf32>
    %53 = math.absf %52 : vector<64x8xf32>
    %cst_27 = arith.constant 0.000000e+00 : f32
    %54 = vector.broadcast %cst_27 : f32 to vector<64x8xf32>
    %55 = arith.subf %54, %53 : vector<64x8xf32>
    %56 = math.exp %55 : vector<64x8xf32>
    %57 = math.log1p %56 : vector<64x8xf32>
    %cst_28 = arith.constant 0.000000e+00 : f32
    %58 = vector.broadcast %cst_28 : f32 to vector<64x8xf32>
    %59 = arith.maximumf %52, %58 : vector<64x8xf32>
    %60 = arith.addf %57, %59 : vector<64x8xf32>
    %61 = tpu.iota {dimensions = array<i32: 1>} : vector<64x8xi32>
    %c4_i32 = arith.constant 4 : i32
    %62 = vector.broadcast %c4_i32 : i32 to vector<64x8xi32>
    %63 = arith.cmpi slt, %61, %62 : vector<64x8xi32>
    %64 = arith.select %63, %52, %60 : vector<64x8xi1>, vector<64x8xf32>
    %c0_29 = arith.constant 0 : index
    %c0_30 = arith.constant 0 : index
    %65 = vector.load %arg8[%c0_29, %c0_30] : memref<64x8xf32, #tpu.memory_space<vmem>>, vector<64x8xf32>
    tpu.vector_store %arg8[%c0_29, %c0_30], %64 {strides = array<i32>} : memref<64x8xf32, #tpu.memory_space<vmem>>, vector<64x8xf32>,
    return
  }
}

</mosaic_0001>

<bundles_post_ra>
// kernel: rnn_model_forward.1
= control target key start
LH: loop header
LB: loop body
LE: loop exit
PB: predicated region body
PF: predicated region fallthrough
CT: control target
= control target key end

     0   :  { %vm74_vm0 = vcmask 1043456   ;;  %vm49_vm1 = vcmask 31744   ;;  %v1495_v0 = vmov 0.0   ;;  %vm1496_vm2 = vmmov 0   ;;  %s1875_s1 = inlined_call_operand.vmem [shape: f32[4,32], index: 1, kind: input, shape index: {}]   ;;  %s1876_s2 = inlined_call_operand.vmem [shape: f32[32,32], index: 2, kind: input, shape index: {}]   ;;  %s1877_s0 = inlined_call_operand.vmem [shape: f32[64,4], index: 0, kind: input, shape index: {}]   ;;  %s1878_s3 = inlined_call_operand.vmem [shape: f32[1,32], index: 3, kind: input, shape index: {}]   ;;  %s1879_s4 = inlined_call_operand.vmem [shape: f32[32,32], index: 4, kind: input, shape index: {}]   ;;  %s1880_s6 = inlined_call_operand.vmem [shape: f32[32,8], index: 6, kind: input, shape index: {}]   ;;  %s1881_s5 = inlined_call_operand.vmem [shape: f32[1,32], index: 5, kind: input, shape index: {}]   ;;  %s1882_s7 = inlined_call_operand.vmem [shape: f32[1,8], index: 7, kind: input, shape index: {}]   ;;  %s1883_s8 = inlined_call_operand.vmem [shape: f32[64,8], index: 8, kind: output, shape index: {}]  }
   0x1   :  { %1317 = vmatprep.subr.mxu1 %v1495_v0  ;;  %v41_v1 = vld [vmem:[%s1875_s1] sm:$0xf]  ;;  %v1549_v2 = vld [vmem:[%s1876_s2 + $0x18] sm:$0xff]  ;;  %1325 = vmatprep.mubr.msk.f32.mxu1 %vm1496_vm2, %v1495_v0  ;;  %v34_v4 = vld [vmem:[%s1877_s0 + $0x8] sm:$0xff]  ;;  %vm183_vm3 = vcmask 261120   ;;  %vm1182_vm5 = vcmask 64512  }
   0x2   :  { %v33_v3 = vld [vmem:[%s1877_s0] sm:$0xff]  ;;  %1303 = vmatprep.subr.msk.mxu0 %vm74_vm0, %v41_v1  ;;  %1318 = vmatpush3.msra.mxu1 %v1549_v2  ;;  %v1563_v5 = vld [vmem:[%s1876_s2 + $0x10] sm:$0xff]  ;;  %v1571_v6 = vld [vmem:[%s1876_s2 + $0x8] sm:$0xff] }
   0x3   :  { %1304 = vmatpush3.msk.msra.mxu0 %vm74_vm0, %v41_v1  ;;  %1305 = vmatprep.mubr.msk.f32.mxu0 %vm49_vm1, %v33_v3  ;;  %v1579_v7 = vld [vmem:[%s1876_s2] sm:$0xff]  ;;  %v35_v16 = vld [vmem:[%s1877_s0 + $0x10] sm:$0xff]  ;;  %v36_v17 = vld [vmem:[%s1877_s0 + $0x18] sm:$0xff] }
   0x4   :  { %1319 = vmatprep.subr.mxu1 %v1495_v0  ;;  %1306 = vmatmul.mubr.msk.f32.vlgmr.msra.gmra.mxu0 %vm49_vm1, %v34_v4  ;;  %v1607_v9 = vld [vmem:[%s1878_s3] ss:$0 sm:$0xff]  ;;  %v38_v19 = vld [vmem:[%s1877_s0 + $0x28] sm:$0xff]  ;;  %v39_v20 = vld [vmem:[%s1877_s0 + $0x30] sm:$0xff] }
   0x5   :  { %1320 = vmatpush3.msra.mxu1 %v1563_v5  ;;  %1339 = vmatprep.subr.mxu0 %v1495_v0  ;;  %v37_v18 = vld [vmem:[%s1877_s0 + $0x20] sm:$0xff]  ;;  %v40_v21 = vld [vmem:[%s1877_s0 + $0x38] sm:$0xff]  ;;  %v786_v54 = vld [vmem:[%s1879_s4 + $0x10] sm:$0xff] }
   0x6   :  { %1321 = vmatprep.subr.mxu1 %v1495_v0  ;;  %1340 = vmatpush3.msra.mxu0 %v1549_v2  ;;  %v787_v48 = vld [vmem:[%s1879_s4 + $0x18] sm:$0xff]  ;;  %v785_v55 = vld [vmem:[%s1879_s4 + $0x8] sm:$0xff]  ;;  %v784_v56 = vld [vmem:[%s1879_s4] sm:$0xff] }
   0x7   :  { %1322 = vmatpush3.msra.mxu1 %v1571_v6  ;;  %1341 = vmatprep.subr.mxu0 %v1495_v0  ;;  %v914_v57 = vld [vmem:[%s1880_s6 + $0x18] sm:$0xff] }
   0x8   :  { %1323 = vmatprep.subr.mxu1 %v1495_v0  ;;  %1342 = vmatpush3.msra.mxu0 %v1563_v5 }
   0x9   :  { %1324 = vmatpush3.msra.mxu1 %v1579_v7  ;;  %1343 = vmatprep.subr.mxu0 %v1495_v0 }
   0xa   :  { %1326 = vmatmul.mubr.f32.vlgmr.msra.gmra.mxu1 %v1495_v0  ;;  %1328 = vmatprep.subr.mxu1 %v1495_v0 }
   0xb   :  { %1329 = vmatpush3.msra.mxu1 %v1549_v2  ;;  %1336 = vmatprep.mubr.msk.f32.mxu1 %vm1496_vm2, %v1495_v0 }
   0xc   :  { %1330 = vmatprep.subr.mxu1 %v1495_v0  ;;  %1344 = vmatpush3.msra.mxu0 %v1571_v6 }
   0xd   :  { %1331 = vmatpush3.msra.mxu1 %v1563_v5  ;;  %1345 = vmatprep.subr.mxu0 %v1495_v0 }
   0xe   :  { %1332 = vmatprep.subr.mxu1 %v1495_v0  ;;  %1346 = vmatpush3.msra.mxu0 %v1579_v7 }
   0xf   :  { %1333 = vmatpush3.msra.mxu1 %v1571_v6  ;;  %1361 = vmatprep.subr.mxu0 %v1495_v0 }
  0x10   :  { %1334 = vmatprep.subr.mxu1 %v1495_v0  ;;  %1308 = vmatprep.mubr.msk.f32.mxu0 %vm49_vm1, %v35_v16 }
  0x11   :  { %1335 = vmatpush3.msra.mxu1 %v1579_v7  ;;  %1309 = vmatmul.mubr.msk.f32.gmra.mxu0 %vm49_vm1, %v36_v17 }
  0x12   :  { %1350 = vmatprep.subr.mxu1 %v1495_v0  ;;  %1311 = vmatprep.mubr.msk.f32.mxu0 %vm49_vm1, %v37_v18 }
  0x15   :  { %1312 = vmatmul.mubr.msk.f32.gmra.mxu0 %vm49_vm1, %v38_v19 }
  0x16   :  { %1314 = vmatprep.mubr.msk.f32.mxu0 %vm49_vm1, %v39_v20 }
  0x19   :  { %1315 = vmatmul.mubr.msk.f32.gmra.mxu0 %vm49_vm1, %v40_v21 }
  0x1a   :  { %1347 = vmatprep.mubr.msk.f32.mxu0 %vm1496_vm2, %v1495_v0 }
  0xc4   :  { %v1307_v8 = vpop.f32.mrf.mxu0 }
  0xc5   :  { %v150_v22 = vadd.f32 %v1307_v8, %v1607_v9  ;;  %v912_v8 = vld [vmem:[%s1880_s6 + $0x8] sm:$0xff] }
  0xc6   :  { %v144_v10 = vpop.f32.mrf.mxu0 }
  0xc7   :  { %v145_v11 = vadd.f32 %v1607_v9, %v144_v10 }
  0xca   :  { %v253_v12 = vpop.f32.mrf.mxu1 }
  0xcb   :  { %v257_v13 = vadd.f32 %v253_v12, %v145_v11  ;;  %v911_v12 = vld [vmem:[%s1880_s6] sm:$0xff] }
  0xcc   :  { %v1327_v14 = vpop.f32.mrf.mxu1 }
  0xcd   :  { %1447 = vtanh.f32 %v257_v13 }
  0xd1   :  { %v1310_v27 = vpop.f32.mrf.mxu0 }
  0xd2   :  { %v160_v38 = vadd.f32 %v1310_v27, %v1607_v9 }
  0xd3   :  { %v154_v28 = vpop.f32.mrf.mxu0 }
  0xd4   :  { %v155_v33 = vadd.f32 %v1607_v9, %v154_v28 }
  0xd5   :  { %v1313_v29 = vpop.f32.mrf.mxu0 }
  0xd6   :  { %v170_v49 = vadd.f32 %v1313_v29, %v1607_v9 }
  0xd7   :  { %v164_v30 = vpop.f32.mrf.mxu0 }
  0xd8   :  { %v165_v43 = vadd.f32 %v1607_v9, %v164_v30 }
  0xd9   :  { %v1665_v31 = vpop.f32.mrf.mxu0 }
  0xda   :  { %v1610_v15 = vpop.eup %1447 }
  0xdb   :  { %1337 = vmatmul.mubr.msk.f32.vlgmr.msra.gmra.mxu1 %vm183_vm3, %v1610_v15  ;;  %v1667_v32 = vpop.f32.mrf.mxu0 }
  0xdc   :  { %1351 = vmatpush3.msra.mxu1 %v1549_v2  ;;  %1358 = vmatprep.mubr.msk.f32.mxu1 %vm1496_vm2, %v1495_v0  ;;  %v175_v58 = vadd.f32 %v1607_v9, %v1667_v32 }
  0xdd   :  { %1352 = vmatprep.subr.mxu1 %v1495_v0 }
  0xde   :  { %1353 = vmatpush3.msra.mxu1 %v1563_v5 }
  0xdf   :  { %1354 = vmatprep.subr.mxu1 %v1495_v0 }
  0xe0   :  { %1355 = vmatpush3.msra.mxu1 %v1571_v6 }
  0xe1   :  { %1356 = vmatprep.subr.mxu1 %v1495_v0 }
  0xe2   :  { %1357 = vmatpush3.msra.mxu1 %v1579_v7 }
  0xe3   :  { %1372 = vmatprep.subr.mxu1 %v1495_v0 }
 0x19b   :  { %v328_v23 = vpop.f32.mrf.mxu1 }
 0x19c   :  { %v332_v24 = vadd.f32 %v328_v23, %v150_v22  ;;  %v180_v22 = vadd.f32 %v1665_v31, %v1607_v9 }
 0x19d   :  { %v1338_v25 = vpop.f32.mrf.mxu1 }
 0x19e   :  { %1449 = vtanh.f32 %v332_v24 }
 0x1ab   :  { %v1651_v26 = vpop.eup %1449 }
 0x1ac   :  { %1348 = vmatmul.mubr.msk.f32.vlgmr.msra.gmra.mxu0 %vm183_vm3, %v1651_v26 }
 0x1ad   :  { %1362 = vmatpush3.msra.mxu0 %v1549_v2  ;;  %1369 = vmatprep.mubr.msk.f32.mxu0 %vm1496_vm2, %v1495_v0 }
 0x1ae   :  { %1363 = vmatprep.subr.mxu0 %v1495_v0 }
 0x1af   :  { %1364 = vmatpush3.msra.mxu0 %v1563_v5 }
 0x1b0   :  { %1365 = vmatprep.subr.mxu0 %v1495_v0 }
 0x1b1   :  { %1366 = vmatpush3.msra.mxu0 %v1571_v6 }
 0x1b2   :  { %1367 = vmatprep.subr.mxu0 %v1495_v0 }
 0x1b3   :  { %1368 = vmatpush3.msra.mxu0 %v1579_v7 }
 0x1b4   :  { %1383 = vmatprep.subr.mxu0 %v1495_v0 }
 0x26c   :  { %v403_v34 = vpop.f32.mrf.mxu0 }
 0x26d   :  { %v407_v35 = vadd.f32 %v403_v34, %v155_v33 }
 0x26e   :  { %v1349_v36 = vpop.f32.mrf.mxu0 }
 0x26f   :  { %1451 = vtanh.f32 %v407_v35 }
 0x27c   :  { %v1670_v37 = vpop.eup %1451 }
 0x27d   :  { %1359 = vmatmul.mubr.msk.f32.vlgmr.msra.gmra.mxu1 %vm183_vm3, %v1670_v37 }
 0x27e   :  { %1373 = vmatpush3.msra.mxu1 %v1549_v2  ;;  %1380 = vmatprep.mubr.msk.f32.mxu1 %vm1496_vm2, %v1495_v0 }
 0x27f   :  { %1374 = vmatprep.subr.mxu1 %v1495_v0 }
 0x280   :  { %1375 = vmatpush3.msra.mxu1 %v1563_v5 }
 0x281   :  { %1376 = vmatprep.subr.mxu1 %v1495_v0 }
 0x282   :  { %1377 = vmatpush3.msra.mxu1 %v1571_v6 }
 0x283   :  { %1378 = vmatprep.subr.mxu1 %v1495_v0 }
 0x284   :  { %1379 = vmatpush3.msra.mxu1 %v1579_v7 }
 0x285   :  { %1394 = vmatprep.subr.mxu1 %v1495_v0 }
 0x33d   :  { %v478_v39 = vpop.f32.mrf.mxu1 }
 0x33e   :  { %v482_v40 = vadd.f32 %v478_v39, %v160_v38 }
 0x33f   :  { %v1360_v41 = vpop.f32.mrf.mxu1 }
 0x340   :  { %1453 = vtanh.f32 %v482_v40 }
 0x34d   :  { %v1454_v42 = vpop.eup %1453 }
 0x34e   :  { %1370 = vmatmul.mubr.msk.f32.vlgmr.msra.gmra.mxu0 %vm183_vm3, %v1454_v42 }
 0x34f   :  { %1384 = vmatpush3.msra.mxu0 %v1549_v2  ;;  %1391 = vmatprep.mubr.msk.f32.mxu0 %vm1496_vm2, %v1495_v0 }
 0x350   :  { %1385 = vmatprep.subr.mxu0 %v1495_v0 }
 0x351   :  { %1386 = vmatpush3.msra.mxu0 %v1563_v5 }
 0x352   :  { %1387 = vmatprep.subr.mxu0 %v1495_v0 }
 0x353   :  { %1388 = vmatpush3.msra.mxu0 %v1571_v6 }
 0x354   :  { %1389 = vmatprep.subr.mxu0 %v1495_v0 }
 0x355   :  { %1390 = vmatpush3.msra.mxu0 %v1579_v7 }
 0x356   :  { %1405 = vmatprep.subr.mxu0 %v787_v48 }
 0x40e   :  { %v553_v44 = vpop.f32.mrf.mxu0 }
 0x40f   :  { %v557_v45 = vadd.f32 %v553_v44, %v165_v43 }
 0x410   :  { %v1371_v46 = vpop.f32.mrf.mxu0 }
 0x411   :  { %1455 = vtanh.f32 %v557_v45 }
 0x41e   :  { %v1456_v47 = vpop.eup %1455 }
 0x41f   :  { %1381 = vmatmul.mubr.msk.f32.vlgmr.msra.gmra.mxu1 %vm183_vm3, %v1456_v47 }
 0x420   :  { %1395 = vmatpush3.msra.mxu1 %v1549_v2  ;;  %1402 = vmatprep.mubr.msk.f32.mxu1 %vm1496_vm2, %v1495_v0 }
 0x421   :  { %1396 = vmatprep.subr.mxu1 %v1495_v0 }
 0x422   :  { %1397 = vmatpush3.msra.mxu1 %v1563_v5 }
 0x423   :  { %1398 = vmatprep.subr.mxu1 %v1495_v0 }
 0x424   :  { %1399 = vmatpush3.msra.mxu1 %v1571_v6  ;;  %v913_v6 = vld [vmem:[%s1880_s6 + $0x10] sm:$0xff] }
 0x425   :  { %1400 = vmatprep.subr.mxu1 %v1495_v0  ;;  %v1737_v0 = vld [vmem:[%s1881_s5] ss:$0 sm:$0xff] }
 0x426   :  { %1401 = vmatpush3.msra.mxu1 %v1579_v7 }
 0x427   :  { %1425 = vmatprep.subr.mxu1 %v914_v57 }
 0x4df   :  { %v628_v50 = vpop.f32.mrf.mxu1 }
 0x4e0   :  { %v632_v51 = vadd.f32 %v628_v50, %v170_v49 }
 0x4e1   :  { %v1382_v52 = vpop.f32.mrf.mxu1 }
 0x4e2   :  { %1457 = vtanh.f32 %v632_v51 }
 0x4ef   :  { %v1458_v53 = vpop.eup %1457 }
 0x4f0   :  { %1392 = vmatmul.mubr.msk.f32.vlgmr.msra.gmra.mxu0 %vm183_vm3, %v1458_v53 }
 0x4f1   :  { %1406 = vmatpush3.msra.mxu0 %v787_v48  ;;  %1413 = vmatprep.mubr.msk.f32.mxu0 %vm183_vm3, %v1610_v15 }
 0x4f2   :  { %1407 = vmatprep.subr.mxu0 %v786_v54 }
 0x4f3   :  { %1408 = vmatpush3.msra.mxu0 %v786_v54 }
 0x4f4   :  { %1409 = vmatprep.subr.mxu0 %v785_v55 }
 0x4f5   :  { %1410 = vmatpush3.msra.mxu0 %v785_v55 }
 0x4f6   :  { %1411 = vmatprep.subr.mxu0 %v784_v56 }
 0x4f7   :  { %1412 = vmatpush3.msra.mxu0 %v784_v56 }
 0x4f8   :  { %1414 = vmatmul.mubr.msk.f32.vlgmr.msra.gmra.mxu0 %vm183_vm3, %v1651_v26  ;;  %v1767_v26 = vld [vmem:[%s1882_s7] ss:$0 sm:$0xff] }
 0x4f9   :  { %1416 = vmatprep.mubr.msk.f32.mxu0 %vm183_vm3, %v1670_v37 }
 0x4fc   :  { %1417 = vmatmul.mubr.msk.f32.gmra.mxu0 %vm183_vm3, %v1454_v42 }
 0x4fd   :  { %1419 = vmatprep.mubr.msk.f32.mxu0 %vm183_vm3, %v1456_v47 }
 0x500   :  { %1420 = vmatmul.mubr.msk.f32.gmra.mxu0 %vm183_vm3, %v1458_v53 }
 0x5b0   :  { %v703_v59 = vpop.f32.mrf.mxu0 }
 0x5b1   :  { %v707_v60 = vadd.f32 %v703_v59, %v175_v58 }
 0x5b2   :  { %v1393_v61 = vpop.f32.mrf.mxu0 }
 0x5b3   :  { %1459 = vtanh.f32 %v707_v60 }
 0x5b8   :  { %v1415_v62 = vpop.f32.mrf.mxu0 }
 0x5b9   :  { %v870_v10 = vadd.f32 %v1415_v62, %v1737_v0 }
 0x5ba   :  { %v864_v63 = vpop.f32.mrf.mxu0 }
 0x5bb   :  { %v865_v1 = vadd.f32 %v1737_v0, %v864_v63  ;;  %v904_v14 = vmax.f32 %v870_v10, 0.0 }
 0x5bc   :  { %v1418_v2 = vpop.f32.mrf.mxu0 }
 0x5bd   :  { %v903_v5 = vmax.f32 %v865_v1, 0.0  ;;  %v880_v15 = vadd.f32 %v1418_v2, %v1737_v0  ;;  %v1171_v2 = vlaneseq }
 0x5be   :  { %v874_v3 = vpop.f32.mrf.mxu0 }
 0x5bf   :  { %v875_v11 = vadd.f32 %v1737_v0, %v874_v3  ;;  %v906_v18 = vmax.f32 %v880_v15, 0.0 }
 0x5c0   :  { %v1460_v4 = vpop.eup %1459  ;;  %v1421_v7 = vpop.f32.mrf.mxu0 }
 0x5c1   :  { %1403 = vmatmul.mubr.msk.f32.vlgmr.msra.gmra.mxu1 %vm183_vm3, %v1460_v4  ;;  %1422 = vmatprep.mubr.msk.f32.mxu0 %vm183_vm3, %v1460_v4  ;;  %v905_v16 = vmax.f32 %v875_v11, 0.0  ;;  %v890_v19 = vadd.f32 %v1421_v7, %v1737_v0 }
 0x5c2   :  { %1426 = vmatpush3.msra.mxu1 %v914_v57  ;;  %1433 = vmatprep.mubr.msk.f32.mxu1 %vm183_vm3, %v903_v5  ;;  %v884_v13 = vpop.f32.mrf.mxu0 }
 0x5c3   :  { %1427 = vmatprep.subr.mxu1 %v913_v6  ;;  %v885_v17 = vadd.f32 %v1737_v0, %v884_v13  ;;  %v908_v21 = vmax.f32 %v890_v19, 0.0 }
 0x5c4   :  { %1428 = vmatpush3.msra.mxu1 %v913_v6 }
 0x5c5   :  { %1429 = vmatprep.subr.mxu1 %v912_v8  ;;  %v907_v20 = vmax.f32 %v885_v17, 0.0 }
 0x5c6   :  { %1430 = vmatpush3.msra.mxu1 %v912_v8  ;;  %v1799_v8 = vand.u32 127, %v1171_v2 }
 0x5c7   :  { %1431 = vmatprep.subr.mxu1 %v911_v12 }
 0x5c8   :  { %1432 = vmatpush3.msra.mxu1 %v911_v12  ;;  %vm1173_vm4 = vcmp.lt.s32.totalorder %v1799_v8, 4 }
 0x5c9   :  { %1434 = vmatmul.mubr.msk.f32.vlgmr.msra.gmra.mxu1 %vm183_vm3, %v904_v14 }
 0x5ca   :  { %1436 = vmatprep.mubr.msk.f32.mxu1 %vm183_vm3, %v905_v16 }
 0x5cd   :  { %1437 = vmatmul.mubr.msk.f32.gmra.mxu1 %vm183_vm3, %v906_v18 }
 0x5ce   :  { %1439 = vmatprep.mubr.msk.f32.mxu1 %vm183_vm3, %v907_v20 }
 0x5d1   :  { %1440 = vmatmul.mubr.msk.f32.gmra.mxu1 %vm183_vm3, %v908_v21 }
 0x681   :  { %v778_v23 = vpop.f32.mrf.mxu1 }
 0x682   :  { %v782_v24 = vadd.f32 %v778_v23, %v180_v22 }
 0x683   :  { %v1404_v25 = vpop.f32.mrf.mxu1 }
 0x684   :  { %1461 = vtanh.f32 %v782_v24 }
 0x689   :  { %v1435_v27 = vpop.f32.mrf.mxu1 }
 0x68a   :  { %v1770_v28 = vadd.f32 %v1435_v27, %v1767_v26 }
 0x68b   :  { %v1012_v29 = vpop.f32.mrf.mxu1 }
 0x68c   :  { %v1052_v30 = vand.u32 2147483647, %v1770_v28  ;;  %v1774_v32 = vadd.f32 %v1767_v26, %v1012_v29  ;;  %v1156_v21 = vmax.f32 %v1770_v28, 0.0 }
 0x68d   :  { %v1438_v9 = vpop.f32.mrf.mxu1 }
 0x68e   :  { %v1060_v31 = vsub.f32 0.0, %v1052_v30  ;;  %v1051_v33 = vand.u32 2147483647, %v1774_v32  ;;  %v1778_v34 = vadd.f32 %v1438_v9, %v1767_v26  ;;  %v1155_v24 = vmax.f32 %v1774_v32, 0.0 }
 0x68f   :  { %v1022_v35 = vpop.f32.mrf.mxu1 }
 0x690   :  { %v1069_v36 = vmul.f32 1.442695, %v1060_v31  ;;  %v1059_v37 = vsub.f32 0.0, %v1051_v33  ;;  %v1054_v38 = vand.u32 2147483647, %v1778_v34  ;;  %v1782_v40 = vadd.f32 %v1767_v26, %v1022_v35 }
 0x691   :  { %v1462_v39 = vpop.eup %1461  ;;  %v1441_v41 = vpop.f32.mrf.mxu1  ;;  %v1158_v27 = vmax.f32 %v1778_v34, 0.0 }
 0x692   :  { %1463 = vpow2.f32 %v1069_v36  ;;  %v1067_v42 = vmul.f32 1.442695, %v1059_v37  ;;  %v1062_v43 = vsub.f32 0.0, %v1054_v38  ;;  %v1785_v44 = vadd.f32 %v1441_v41, %v1767_v26  ;;  %1423 = vmatmul.mubr.msk.f32.gmra.mxu0 %vm183_vm3, %v1462_v39 }
 0x693   :  { %v1053_v45 = vand.u32 2147483647, %v1782_v40  ;;  %v1032_v46 = vpop.f32.mrf.mxu1 }
 0x694   :  { %1465 = vpow2.f32 %v1067_v42  ;;  %v1073_v47 = vmul.f32 1.442695, %v1062_v43  ;;  %v1056_v48 = vand.u32 2147483647, %v1785_v44  ;;  %v1791_v50 = vadd.f32 %v1767_v26, %v1032_v46 }
 0x695   :  { %v1061_v49 = vsub.f32 0.0, %v1053_v45 }
 0x696   :  { %1467 = vpow2.f32 %v1073_v47  ;;  %v1064_v51 = vsub.f32 0.0, %v1056_v48  ;;  %v1055_v53 = vand.u32 2147483647, %v1791_v50 }
 0x697   :  { %v1071_v52 = vmul.f32 1.442695, %v1061_v49 }
 0x698   :  { %v1077_v54 = vmul.f32 1.442695, %v1064_v51  ;;  %v1063_v55 = vsub.f32 0.0, %v1055_v53  ;;  %v1157_v51 = vmax.f32 %v1782_v40, 0.0 }
 0x699   :  { %1469 = vpow2.f32 %v1071_v52 }
 0x69a   :  { %1471 = vpow2.f32 %v1077_v54  ;;  %v1075_v56 = vmul.f32 1.442695, %v1063_v55 }
 0x69c   :  { %1473 = vpow2.f32 %v1075_v56 }
 0x69f   :  { %v1464_v57 = vpop.eup %1463 }
 0x6a0   :  { %v1092_v58 = vadd.f32 1.0, %v1464_v57  ;;  %v1095_v4 = vmul.f32 -0.5, %v1464_v57  ;;  %v1098_v13 = vand.u32 2147483647, %v1464_v57 }
 0x6a1   :  { %v1466_v59 = vpop.eup %1465 }
 0x6a2   :  { %1475 = vlog2.f32 %v1092_v58  ;;  %v1083_v60 = vadd.f32 1.0, %v1466_v59  ;;  %v1086_v7 = vmul.f32 -0.5, %v1466_v59  ;;  %v1096_v12 = vadd.f32 1.0, %v1095_v4 }
 0x6a3   :  { %v1468_v61 = vpop.eup %1467  ;;  %v1089_v17 = vand.u32 2147483647, %v1466_v59  ;;  %vm1099_vm6 = vcmp.lt.f32.partialorder %v1098_v13, 0.0004427343  ;;  %v1159_v4 = vmax.f32 %v1791_v50, 0.0 }
 0x6a4   :  { %1477 = vlog2.f32 %v1083_v60  ;;  %v1110_v62 = vadd.f32 1.0, %v1468_v61  ;;  %v1113_v10 = vmul.f32 -0.5, %v1468_v61  ;;  %v1087_v14 = vadd.f32 1.0, %v1086_v7 }
 0x6a5   :  { %v1097_v20 = vmul.f32 %v1464_v57, %v1096_v12  ;;  %v1116_v25 = vand.u32 2147483647, %v1468_v61  ;;  %vm1090_vm7 = vcmp.lt.f32.partialorder %v1089_v17, 0.0004427343 }
 0x6a6   :  { %v1470_v63 = vpop.eup %1469  ;;  %1479 = vlog2.f32 %v1110_v62  ;;  %v1114_v18 = vadd.f32 1.0, %v1113_v10  ;;  %v1088_v9 = vmul.f32 %v1466_v59, %v1087_v14 }
 0x6a7   :  { %v1794_v1 = vpop.eup %1471  ;;  %v1101_v3 = vadd.f32 1.0, %v1470_v63  ;;  %v1104_v15 = vmul.f32 -0.5, %v1470_v63  ;;  %v1107_v41 = vand.u32 2147483647, %v1470_v63  ;;  %vm1117_vm8 = vcmp.lt.f32.partialorder %v1116_v25, 0.0004427343 }
 0x6a8   :  { %v1128_v5 = vadd.f32 1.0, %v1794_v1  ;;  %v1131_v22 = vmul.f32 -0.5, %v1794_v1  ;;  %v1115_v36 = vmul.f32 %v1468_v61, %v1114_v18  ;;  %v1134_v46 = vand.u32 2147483647, %v1794_v1 }
 0x6a9   :  { %1481 = vlog2.f32 %v1101_v3  ;;  %v1797_v6 = vpop.eup %1473  ;;  %v1105_v31 = vadd.f32 1.0, %v1104_v15  ;;  %vm1108_vm9 = vcmp.lt.f32.partialorder %v1107_v41, 0.0004427343 }
 0x6aa   :  { %1483 = vlog2.f32 %v1128_v5  ;;  %v1119_v11 = vadd.f32 1.0, %v1797_v6  ;;  %v1122_v37 = vmul.f32 -0.5, %v1797_v6  ;;  %v1132_v42 = vadd.f32 1.0, %v1131_v22 }
 0x6ab   :  { %v1106_v49 = vmul.f32 %v1470_v63, %v1105_v31  ;;  %v1125_v58 = vand.u32 2147483647, %v1797_v6  ;;  %vm1135_vm10 = vcmp.lt.f32.partialorder %v1134_v46, 0.0004427343 }
 0x6ac   :  { %1485 = vlog2.f32 %v1119_v11  ;;  %v1123_v55 = vadd.f32 1.0, %v1122_v37  ;;  %v1133_v57 = vmul.f32 %v1794_v1, %v1132_v42 }
 0x6ad   :  { %vm1126_vm11 = vcmp.lt.f32.partialorder %v1125_v58, 0.0004427343 }
 0x6ae   :  { %v1124_v3 = vmul.f32 %v1797_v6, %v1123_v55 }
 0x6af   :  { %v1476_v16 = vpop.eup %1475 }
 0x6b0   :  { %v1094_v19 = vmul.f32 0.6931472, %v1476_v16 }
 0x6b1   :  { %v1478_v23 = vpop.eup %1477 }
 0x6b2   :  { %v1100_v29 = vsel %vm1099_vm6, %v1097_v20, %v1094_v19  ;;  %v1085_v30 = vmul.f32 0.6931472, %v1478_v23 }
 0x6b3   :  { %v1480_v33 = vpop.eup %1479  ;;  %v1164_v35 = vadd.f32 %v1156_v21, %v1100_v29 }
 0x6b4   :  { %v1091_v38 = vsel %vm1090_vm7, %v1088_v9, %v1085_v30  ;;  %v1112_v39 = vmul.f32 0.6931472, %v1480_v33 }
 0x6b5   :  { %v1175_v43 = vsel %vm1173_vm4, %v1770_v28, %v1164_v35  ;;  %v1163_v45 = vadd.f32 %v1155_v24, %v1091_v38 }
 0x6b6   :  { %v1482_v47 = vpop.eup %1481  ;;  %1184 = vst.msk [vmem:[%s1883_s8 + $0x8] sm:$0xff] %vm1182_vm5, %v1175_v43  ;;  %v1118_v48 = vsel %vm1117_vm8, %v1115_v36, %v1112_v39 }
 0x6b7   :  { %v1484_v52 = vpop.eup %1483  ;;  %v1174_v53 = vsel %vm1173_vm4, %v1774_v32, %v1163_v45  ;;  %v1166_v28 = vadd.f32 %v1158_v27, %v1118_v48  ;;  %v1103_v54 = vmul.f32 0.6931472, %v1482_v47  ;;  %v1160_v32 = vmax.f32 %v1785_v44, 0.0 }
 0x6b8   :  { %1183 = vst.msk [vmem:[%s1883_s8] sm:$0xff] %vm1182_vm5, %v1174_v53  ;;  %v1130_v56 = vmul.f32 0.6931472, %v1484_v52 }
 0x6b9   :  { %v1177_v59 = vsel %vm1173_vm4, %v1778_v34, %v1166_v28  ;;  %v1109_v60 = vsel %vm1108_vm9, %v1106_v49, %v1103_v54  ;;  %v1486_v61 = vpop.eup %1485 }
 0x6ba   :  { %1186 = vst.msk [vmem:[%s1883_s8 + $0x18] sm:$0xff] %vm1182_vm5, %v1177_v59  ;;  %v1165_v62 = vadd.f32 %v1157_v51, %v1109_v60  ;;  %v1136_v63 = vsel %vm1135_vm10, %v1133_v57, %v1130_v56  ;;  %v1121_v1 = vmul.f32 0.6931472, %v1486_v61 }
 0x6bb   :  { %v1168_v2 = vadd.f32 %v1160_v32, %v1136_v63 }
 0x6bc   :  { %v1176_v34 = vsel %vm1173_vm4, %v1782_v40, %v1165_v62  ;;  %v1127_v7 = vsel %vm1126_vm11, %v1124_v3, %v1121_v1 }
 0x6bd   :  { %1185 = vst.msk [vmem:[%s1883_s8 + $0x10] sm:$0xff] %vm1182_vm5, %v1176_v34  ;;  %v1179_v5 = vsel %vm1173_vm4, %v1785_v44, %v1168_v2  ;;  %v1167_v6 = vadd.f32 %v1159_v4, %v1127_v7 }
 0x6be   :  { %1188 = vst.msk [vmem:[%s1883_s8 + $0x28] sm:$0xff] %vm1182_vm5, %v1179_v5 }
 0x6bf   :  { %v1178_v40 = vsel %vm1173_vm4, %v1791_v50, %v1167_v6 }
 0x6c0   :  { %1187 = vst.msk [vmem:[%s1883_s8 + $0x20] sm:$0xff] %vm1182_vm5, %v1178_v40 }
 0x752   :  { %v1424_v10 = vpop.f32.mrf.mxu0 }
 0x753   :  { %v900_v11 = vadd.f32 %v1424_v10, %v1737_v0 }
 0x754   :  { %v894_v44 = vpop.f32.mrf.mxu0 }
 0x755   :  { %v895_v12 = vadd.f32 %v1737_v0, %v894_v44  ;;  %v910_v14 = vmax.f32 %v900_v11, 0.0 }
 0x757   :  { %v909_v13 = vmax.f32 %v895_v12, 0.0 }
 0x759   :  { %1442 = vmatprep.mubr.msk.f32.mxu1 %vm183_vm3, %v909_v13 }
 0x75a   :  { %1443 = vmatmul.mubr.msk.f32.gmra.mxu1 %vm183_vm3, %v910_v14 }
 0x81a   :  { %v1444_v15 = vpop.f32.mrf.mxu1 }
 0x81b   :  { %v1048_v50 = vadd.f32 %v1444_v15, %v1767_v26 }
 0x81c   :  { %v1042_v16 = vpop.f32.mrf.mxu1 }
 0x81d   :  { %v1058_v17 = vand.u32 2147483647, %v1048_v50  ;;  %v1043_v18 = vadd.f32 %v1767_v26, %v1042_v16  ;;  %v1162_v39 = vmax.f32 %v1048_v50, 0.0 }
 0x81f   :  { %v1066_v19 = vsub.f32 0.0, %v1058_v17  ;;  %v1057_v20 = vand.u32 2147483647, %v1043_v18  ;;  %v1161_v46 = vmax.f32 %v1043_v18, 0.0 }
 0x821   :  { %v1081_v21 = vmul.f32 1.442695, %v1066_v19  ;;  %v1065_v22 = vsub.f32 0.0, %v1057_v20 }
 0x823   :  { %1487 = vpow2.f32 %v1081_v21  ;;  %v1079_v23 = vmul.f32 1.442695, %v1065_v22 }
 0x825   :  { %1489 = vpow2.f32 %v1079_v23 }
 0x830   :  { %v1488_v0 = vpop.eup %1487 }
 0x831   :  { %v1146_v24 = vadd.f32 1.0, %v1488_v0  ;;  %v1149_v29 = vmul.f32 -0.5, %v1488_v0  ;;  %v1152_v31 = vand.u32 2147483647, %v1488_v0 }
 0x832   :  { %v1490_v25 = vpop.eup %1489 }
 0x833   :  { %1491 = vlog2.f32 %v1146_v24  ;;  %v1137_v27 = vadd.f32 1.0, %v1490_v25  ;;  %v1140_v30 = vmul.f32 -0.5, %v1490_v25  ;;  %v1150_v9 = vadd.f32 1.0, %v1149_v29 }
 0x834   :  { %v1143_v26 = vand.u32 2147483647, %v1490_v25  ;;  %vm1153_vm12 = vcmp.lt.f32.partialorder %v1152_v31, 0.0004427343 }
 0x835   :  { %1493 = vlog2.f32 %v1137_v27  ;;  %v1141_v33 = vadd.f32 1.0, %v1140_v30  ;;  %v1151_v37 = vmul.f32 %v1488_v0, %v1150_v9 }
 0x836   :  { %vm1144_vm13 = vcmp.lt.f32.partialorder %v1143_v26, 0.0004427343 }
 0x837   :  { %v1142_v43 = vmul.f32 %v1490_v25, %v1141_v33 }
 0x840   :  { %v1492_v35 = vpop.eup %1491 }
 0x841   :  { %v1148_v36 = vmul.f32 0.6931472, %v1492_v35 }
 0x842   :  { %v1494_v38 = vpop.eup %1493 }
 0x843   :  { %v1154_v41 = vsel %vm1153_vm12, %v1151_v37, %v1148_v36  ;;  %v1139_v42 = vmul.f32 0.6931472, %v1494_v38 }
 0x844   :  { %v1170_v45 = vadd.f32 %v1162_v39, %v1154_v41 }
 0x845   :  { %v1145_v47 = vsel %vm1144_vm13, %v1142_v43, %v1139_v42 }
 0x846   :  { %v1181_v48 = vsel %vm1173_vm4, %v1048_v50, %v1170_v45  ;;  %v1169_v49 = vadd.f32 %v1161_v46, %v1145_v47 }
 0x847   :  { %1190 = vst.msk [vmem:[%s1883_s8 + $0x38] sm:$0xff] %vm1182_vm5, %v1181_v48 }
 0x848   :  { %v1180_v51 = vsel %vm1173_vm4, %v1043_v18, %v1169_v49 }
 0x849   :  { %1189 = vst.msk [vmem:[%s1883_s8 + $0x30] sm:$0xff] %vm1182_vm5, %v1180_v51 }

</bundles_post_ra>
